<compile_context>
chip_gen: v7x
topology: tpu7x:2x2x1
jax: 0.10.0
libtpu: 0.0.40
codegen_flags: <defaults>
</compile_context>

<pallas_src>
import jax
import jax.numpy as jnp
from jax.experimental import pallas as pl
from jax.experimental.pallas import tpu as pltpu

EPS = 1e-5      # BatchNorm2d default eps
ALPHA = 0.2     # LeakyReLU negative slope


def _round_up(x, m):
    return (x + m - 1) // m * m


# ---------------- pass 1: conv-as-GEMM + per-tile channel stats ----------------
def _gemm_stats_kernel(p_ref, w_ref, y_ref, stats_ref, acc_ref):
    k = pl.program_id(1)

    @pl.when(k == 0)
    def _():
        acc_ref[...] = jnp.zeros_like(acc_ref)

    acc_ref[...] += jnp.dot(p_ref[...], w_ref[...],
                            preferred_element_type=jnp.float32)

    @pl.when(k == pl.num_programs(1) - 1)
    def _():
        y = acc_ref[...]
        y_ref[...] = y
        # fused per-(M tile) per-channel partial stats in the GEMM epilogue
        sums = jnp.sum(y, axis=0, keepdims=True)        # (1, Cp)
        sumsq = jnp.sum(y * y, axis=0, keepdims=True)   # (1, Cp)
        stats_ref[0] = jnp.concatenate([sums, sumsq], axis=0)


# ---------------- pass 2: normalize + LeakyReLU ----------------
def _bn_lrelu_kernel(y_ref, scale_ref, shift_ref, o_ref):
    z = y_ref[...] * scale_ref[...] + shift_ref[...]
    o_ref[...] = jnp.where(z >= 0.0, z, ALPHA * z)


def d_block(X, weight, gamma, beta, stride=2, pad=1, tm=256, tk_target=512):
    """X: (N, C_in, H, W) NCHW f32; weight: (C_out, C_in, KH, KW) OIHW."""
    N, C_in, H, W = X.shape
    C_out, _, KH, KW = weight.shape
    HO = (H + 2 * pad - KH) // stride + 1
    WO = (W + 2 * pad - KW) // stride + 1
    M = N * HO * WO
    Kdim = C_in * KH * KW

    # ---- tile / padded sizes (lane dim made dense: channels padded to 128) ----
    Cp = _round_up(C_out, 128)
    tm = min(tm, _round_up(M, 8))
    Mp = _round_up(M, tm)
    nm = Mp // tm
    nk = -(-Kdim // tk_target)
    tk = _round_up(-(-Kdim // nk), 128)
    Kp = tk * nk

    # ---- glue: im2col (pure reshuffle, no FLOPs), bf16 MXU operands ----
    # TODO(synk): replace the materialized im2col with an in-kernel implicit
    # GEMM (KH*KW shifted matmuls over an NHWC input tile) to remove the
    # ~(k/s)^2 HBM read inflation entirely.
    Xp = jnp.pad(X, ((0, 0), (0, 0), (pad, pad), (pad, pad)))
    cols = []
    for kh in range(KH):
        for kw in range(KW):
            cols.append(Xp[:, :, kh:kh + stride * HO:stride,
                            kw:kw + stride * WO:stride])
    pat = jnp.stack(cols, axis=-1)              # (N, C_in, HO, WO, KH*KW)
    pat = pat.transpose(0, 2, 3, 1, 4)          # (N, HO, WO, C_in, KH*KW)
    pat = pat.reshape(M, Kdim)                  # rows=(n,ho,wo), cols=(c,kh,kw)
    pat = jnp.pad(pat, ((0, Mp - M), (0, Kp - Kdim))).astype(jnp.bfloat16)
    w2d = weight.reshape(C_out, Kdim).T         # (Kdim, C_out)
    w2d = jnp.pad(w2d, ((0, Kp - Kdim), (0, Cp - C_out))).astype(jnp.bfloat16)
    gamma_p = jnp.pad(gamma.astype(jnp.float32), (0, Cp - C_out),
                      constant_values=1.0)
    beta_p = jnp.pad(beta.astype(jnp.float32), (0, Cp - C_out))

    # ---- pass 1: tiled GEMM (M parallel, K reduction innermost) + stats ----
    y, stats = pl.pallas_call(
        _gemm_stats_kernel,
        out_shape=(jax.ShapeDtypeStruct((Mp, Cp), jnp.float32),
                   jax.ShapeDtypeStruct((nm, 2, Cp), jnp.float32)),
        grid_spec=pltpu.PrefetchScalarGridSpec(
            num_scalar_prefetch=0,
            grid=(nm, nk),
            in_specs=[pl.BlockSpec((tm, tk), lambda i, k: (i, k)),
                      pl.BlockSpec((tk, Cp), lambda i, k: (k, 0))],
            out_specs=[pl.BlockSpec((tm, Cp), lambda i, k: (i, 0)),
                       pl.BlockSpec((1, 2, Cp), lambda i, k: (i, 0, 0))],
            scratch_shapes=[pltpu.VMEM((tm, Cp), jnp.float32)]),
        compiler_params=pltpu.CompilerParams(
            dimension_semantics=("parallel", "arbitrary")),
    )(pat, w2d)

    # ---- tiny cross-tile reduction + per-channel scale/shift (f32) ----
    # zero-padded rows/channels contribute 0 to both sums, so dividing by the
    # true M gives exact batch statistics (biased variance, training mode).
    mean = jnp.sum(stats[:, 0, :], axis=0) / M
    var = jnp.maximum(jnp.sum(stats[:, 1, :], axis=0) / M - mean * mean, 0.0)
    scale = gamma_p * jax.lax.rsqrt(var + EPS)
    shift = beta_p - mean * scale

    # ---- pass 2: streamed normalize + LeakyReLU (M parallel, lane-dense) ----
    out2d = pl.pallas_call(
        _bn_lrelu_kernel,
        out_shape=jax.ShapeDtypeStruct((Mp, Cp), jnp.float32),
        grid_spec=pltpu.PrefetchScalarGridSpec(
            num_scalar_prefetch=0,
            grid=(nm,),
            in_specs=[pl.BlockSpec((tm, Cp), lambda i: (i, 0)),
                      pl.BlockSpec((1, Cp), lambda i: (0, 0)),
                      pl.BlockSpec((1, Cp), lambda i: (0, 0))],
            out_specs=pl.BlockSpec((tm, Cp), lambda i: (i, 0))),
        compiler_params=pltpu.CompilerParams(
            dimension_semantics=("parallel",)),
    )(y, scale.reshape(1, Cp), shift.reshape(1, Cp))

    # back to NCHW (kept only to match the PyTorch module's external contract;
    # a consumer that accepts NHWC could skip this transpose)
    return out2d[:M, :C_out].reshape(N, HO, WO, C_out).transpose(0, 3, 1, 2)


def _reference(X, Wt, gamma, beta, S, P):
    # conv with the same bf16-rounded operands / f32 accumulation as the kernel,
    # then train-mode batchnorm + LeakyReLU in f32.
    conv = jax.lax.conv_general_dilated(
        X.astype(jnp.bfloat16), Wt.astype(jnp.bfloat16),
        window_strides=(S, S), padding=((P, P), (P, P)),
        dimension_numbers=("NCHW", "OIHW", "NCHW"),
        preferred_element_type=jnp.float32)
    mean = conv.mean(axis=(0, 2, 3), keepdims=True)
    var = ((conv - mean) ** 2).mean(axis=(0, 2, 3), keepdims=True)
    ref = (conv - mean) * jax.lax.rsqrt(var + EPS)
    ref = ref * gamma.reshape(1, -1, 1, 1) + beta.reshape(1, -1, 1, 1)
    return jnp.where(ref >= 0, ref, ALPHA * ref)


if __name__ == "__main__":
    key = jax.random.PRNGKey(0)

    # ---- test 1: shapes implied by the module defaults (in_channels=3, k=4,
    #              s=2, p=1) at small size ----
    kx, kw = jax.random.split(key)
    N, C_in, H, W = 2, 3, 16, 16
    C_out, K, S, P = 8, 4, 2, 1

    X = jax.random.normal(kx, (N, C_in, H, W), dtype=jnp.float32)
    Wt = jax.random.normal(kw, (C_out, C_in, K, K), dtype=jnp.float32) * 0.1
    gamma = jnp.ones((C_out,), jnp.float32)   # BatchNorm2d weight init
    beta = jnp.zeros((C_out,), jnp.float32)   # BatchNorm2d bias init

    out = jax.block_until_ready(d_block(X, Wt, gamma, beta, stride=S, pad=P))
    assert out.shape == (N, C_out, H // 2, W // 2)
    ref = _reference(X, Wt, gamma, beta, S, P)
    err = float(jnp.max(jnp.abs(out - ref)))
    assert jnp.allclose(out, ref, atol=2e-3, rtol=2e-3), err

    # ---- test 2: larger channels, multi-tile grid (exercises the tiled M and
    #              K paths and the cross-tile stats reduction) ----
    kx2, kw2, kg, kb = jax.random.split(jax.random.PRNGKey(1), 4)
    N2, C_in2, H2, W2, C_out2 = 2, 16, 32, 32, 32
    X2 = jax.random.normal(kx2, (N2, C_in2, H2, W2), dtype=jnp.float32)
    Wt2 = jax.random.normal(kw2, (C_out2, C_in2, K, K), dtype=jnp.float32) * 0.05
    gamma2 = 1.0 + 0.1 * jax.random.normal(kg, (C_out2,), dtype=jnp.float32)
    beta2 = 0.1 * jax.random.normal(kb, (C_out2,), dtype=jnp.float32)

    out2 = jax.block_until_ready(
        d_block(X2, Wt2, gamma2, beta2, stride=S, pad=P, tm=256, tk_target=128))
    assert out2.shape == (N2, C_out2, H2 // 2, W2 // 2)
    ref2 = _reference(X2, Wt2, gamma2, beta2, S, P)
    err2 = float(jnp.max(jnp.abs(out2 - ref2)))
    assert jnp.allclose(out2, ref2, atol=2e-3, rtol=2e-3), err2

    print("KERNEL_OK")
</pallas_src>

<mosaic_0001>
module attributes {stable_mosaic.version = 11 : i64} {
  func.func @_gemm_stats_kernel(%arg0: i32, %arg1: i32, %arg2: memref<128x128xbf16, #tpu.memory_space<vmem>>, %arg3: memref<128x128xbf16, #tpu.memory_space<vmem>>, %arg4: memref<128x128xf32, #tpu.memory_space<vmem>>, %arg5: memref<1x2x128xf32, #tpu.memory_space<vmem>>, %arg6: memref<128x128xf32, #tpu.memory_space<vmem>>) attributes {dimension_semantics = [#tpu.dimension_semantics<parallel>, #tpu.dimension_semantics<arbitrary>], iteration_bounds = array<i64: 1, 1>, scalar_prefetch = 0 : i64, scratch_operands = 1 : i64, tpu.core_type = #tpu.core_type<tc>, window_params = [{transform_indices = @transform_0, window_bounds = array<i64: 128, 128>}, {transform_indices = @transform_1, window_bounds = array<i64: 128, 128>}, {transform_indices = @transform_2, window_bounds = array<i64: 128, 128>}, {transform_indices = @transform_3, window_bounds = array<i64: 1, 2, 128>}]} {
    %c0_i32 = arith.constant 0 : i32
    %0 = arith.cmpi eq, %arg1, %c0_i32 : i32
    %1 = arith.extui %0 : i1 to i32
    %c0_i32_0 = arith.constant 0 : i32
    %2 = arith.cmpi ne, %1, %c0_i32_0 : i32
    scf.if %2 {
      %cst_10 = arith.constant 0.000000e+00 : f32
      %12 = vector.broadcast %cst_10 : f32 to vector<128x128xf32>
      %c0_11 = arith.constant 0 : index
      %c0_12 = arith.constant 0 : index
      %13 = vector.load %arg6[%c0_11, %c0_12] : memref<128x128xf32, #tpu.memory_space<vmem>>, vector<128x128xf32>
      tpu.vector_store %arg6[%c0_11, %c0_12], %12 {strides = array<i32>} : memref<128x128xf32, #tpu.memory_space<vmem>>, vector<128x128xf32>,
    } else {
    }
    %c0 = arith.constant 0 : index
    %c0_1 = arith.constant 0 : index
    %3 = vector.load %arg6[%c0, %c0_1] : memref<128x128xf32, #tpu.memory_space<vmem>>, vector<128x128xf32>
    %c0_2 = arith.constant 0 : index
    %c0_3 = arith.constant 0 : index
    %4 = vector.load %arg2[%c0_2, %c0_3] : memref<128x128xbf16, #tpu.memory_space<vmem>>, vector<128x128xbf16>
    %c0_4 = arith.constant 0 : index
    %c0_5 = arith.constant 0 : index
    %5 = vector.load %arg3[%c0_4, %c0_5] : memref<128x128xbf16, #tpu.memory_space<vmem>>, vector<128x128xbf16>
    %cst = arith.constant dense<0.000000e+00> : vector<128x128xf32>
    %6 = tpu.matmul %4, %5, %cst {dimension_numbers = #tpu.dot_dimension_numbers<[1], [0], [0], [1], [0, 0, 1, 1], [], []>} : vector<128x128xbf16>, vector<128x128xbf16>, vector<128x128xf32> -> vector<128x128xf32>
    %7 = arith.addf %3, %6 : vector<128x128xf32>
    %c0_6 = arith.constant 0 : index
    %c0_7 = arith.constant 0 : index
    %8 = vector.load %arg6[%c0_6, %c0_7] : memref<128x128xf32, #tpu.memory_space<vmem>>, vector<128x128xf32>
    tpu.vector_store %arg6[%c0_6, %c0_7], %7 {strides = array<i32>} : memref<128x128xf32, #tpu.memory_space<vmem>>, vector<128x128xf32>,
    %c0_i32_8 = arith.constant 0 : i32
    %9 = arith.cmpi eq, %arg1, %c0_i32_8 : i32
    %10 = arith.extui %9 : i1 to i32
    %c0_i32_9 = arith.constant 0 : i32
    %11 = arith.cmpi ne, %10, %c0_i32_9 : i32
    scf.if %11 {
      %c0_10 = arith.constant 0 : index
      %c0_11 = arith.constant 0 : index
      %12 = vector.load %arg6[%c0_10, %c0_11] : memref<128x128xf32, #tpu.memory_space<vmem>>, vector<128x128xf32>
      %c0_12 = arith.constant 0 : index
      %c0_13 = arith.constant 0 : index
      %13 = vector.load %arg4[%c0_12, %c0_13] : memref<128x128xf32, #tpu.memory_space<vmem>>, vector<128x128xf32>
      tpu.vector_store %arg4[%c0_12, %c0_13], %12 {strides = array<i32>} : memref<128x128xf32, #tpu.memory_space<vmem>>, vector<128x128xf32>,
      %cst_14 = arith.constant dense<0.000000e+00> : vector<128xf32>
      %14 = vector.multi_reduction <add>, %12, %cst_14 [0] : vector<128x128xf32> to vector<128xf32>
      %15 = vector.shape_cast %14 : vector<128xf32> to vector<1x128xf32>
      %16 = arith.mulf %12, %12 : vector<128x128xf32>
      %cst_15 = arith.constant dense<0.000000e+00> : vector<128xf32>
      %17 = vector.multi_reduction <add>, %16, %cst_15 [0] : vector<128x128xf32> to vector<128xf32>
      %18 = vector.shape_cast %17 : vector<128xf32> to vector<1x128xf32>
      %19 = tpu.concatenate %15, %18 in 0 : vector<1x128xf32>, vector<1x128xf32> -> vector<2x128xf32>
      %c0_16 = arith.constant 0 : index
      %c0_17 = arith.constant 0 : index
      %c0_18 = arith.constant 0 : index
      %20 = vector.load %arg5[%c0_16, %c0_17, %c0_18] : memref<1x2x128xf32, #tpu.memory_space<vmem>>, vector<1x2x128xf32>
      %21 = vector.shape_cast %20 : vector<1x2x128xf32> to vector<2x128xf32>
      %22 = vector.shape_cast %19 : vector<2x128xf32> to vector<1x2x128xf32>
      tpu.vector_store %arg5[%c0_16, %c0_17, %c0_18], %22 {strides = array<i32>} : memref<1x2x128xf32, #tpu.memory_space<vmem>>, vector<1x2x128xf32>,
    } else {
    }
    return
  }
  func.func @transform_0(%arg0: i32, %arg1: i32) -> (i32, i32) {
    %c0_i32 = arith.constant 0 : i32
    return %arg0, %arg1 : i32, i32
  }
  func.func @transform_1(%arg0: i32, %arg1: i32) -> (i32, i32) {
    %c0_i32 = arith.constant 0 : i32
    %c0_i32_0 = arith.constant 0 : i32
    return %arg1, %c0_i32 : i32, i32
  }
  func.func @transform_2(%arg0: i32, %arg1: i32) -> (i32, i32) {
    %c0_i32 = arith.constant 0 : i32
    %c0_i32_0 = arith.constant 0 : i32
    return %arg0, %c0_i32 : i32, i32
  }
  func.func @transform_3(%arg0: i32, %arg1: i32) -> (i32, i32, i32) {
    %c0_i32 = arith.constant 0 : i32
    %c0_i32_0 = arith.constant 0 : i32
    %c0_i32_1 = arith.constant 0 : i32
    return %arg0, %c0_i32, %c0_i32_0 : i32, i32, i32
  }
}

</mosaic_0001>

<bundles_post_ra>
// kernel: tpu_custom_call.1
= control target key start
LH: loop header
LB: loop body
LE: loop exit
PB: predicated region body
PF: predicated region fallthrough
CT: control target
= control target key end

     0   :  { %9 = vsyncpa [#allocation4], 0  ;;  %s759_s0 = inlined_call_operand.hbm [shape: bf16[128,128], index: 0, kind: input, shape index: {}]   ;;  %s760_s1 = inlined_call_operand.hbm [shape: bf16[128,128], index: 1, kind: input, shape index: {}]   ;;  %s761_s2 = inlined_call_operand.hbm [shape: f32[128,128], index: 2, kind: output, shape index: {0}]   ;;  %s762_s3 = inlined_call_operand.hbm [shape: f32[1,2,128], index: 3, kind: output, shape index: {1}]  }
   0x1   :  { %10 = vsyncpa [#allocation7], 0 }
   0x2   :  { %11 = vsyncpa [#allocation5], 0 }
   0x3   :  { %12 = vsyncpa [#allocation10], 0  ;;  %s665_s12 = smov [#allocation3]   ;;  %s569_s16 = scalar_lea.hbm %s759_s0, 1024 }
   0x4   :  { %s18_s13 = sshll.u32 %s665_s12, 4  ;;  %p570_p0 = scmp.ne.s32.totalorder %s759_s0, %s569_s16  ;;  %s19_s13 = int_to_ptr.vmem [resolvable:$true] %s18_s13 }
   0x5   :  { %p573_p1 = scmp.lt.u32.totalorder %s569_s16, %s759_s0 }
   0x7   :  { %p575_p2 = pnand %p573_p1, %p570_p0 }
   0x9   :  { %578 = shalt.err (!%p575_p2)
}
   0xa   :  { %s579_s21 = scalar_lea.vmem %s19_s13, 1024  ;;  %p584_p4 = scmp.lt.s32.totalorder %s19_s13, %s19_s13 }
   0xb   :  { %p580_p3 = scmp.ne.s32.totalorder %s19_s13, %s579_s21  ;;  %p585_p5 = scmp.lt.s32.totalorder %s579_s21, %s579_s21 }
   0xd   :  { %p586_p6 = por %p585_p5, %p584_p4 }
   0xf   :  { %p587_p7 = pnand %p586_p6, %p580_p3 }
  0x11   :  { %590 = shalt.err (!%p587_p7)
}
  0x12   :  { %s666_s22 = smov 64   ;;  %s667_s23 = smov 4  }
  0x13   :  { %24 = dma.hbm_to_vmem [thread:$0]  %s759_s0, 1024, %s19_s13, [#allocation4], %s666_s22, %s666_s22, %s667_s23  }
  0x14   :  { %s668_s26 = smov [#allocation6]   ;;  %s591_s30 = scalar_lea.hbm %s760_s1, 1024 }
  0x15   :  { %s30_s27 = sshll.u32 %s668_s26, 4  ;;  %p592_p8 = scmp.ne.s32.totalorder %s760_s1, %s591_s30  ;;  %s31_s27 = int_to_ptr.vmem [resolvable:$true] %s30_s27 }
  0x16   :  { %p595_p9 = scmp.lt.u32.totalorder %s591_s30, %s760_s1 }
  0x18   :  { %p597_p10 = pnand %p595_p9, %p592_p8 }
  0x1a   :  { %600 = shalt.err (!%p597_p10)
}
  0x1b   :  { %s601_s8 = scalar_lea.vmem %s31_s27, 1024  ;;  %p606_p12 = scmp.lt.s32.totalorder %s31_s27, %s31_s27 }
  0x1c   :  { %p602_p11 = scmp.ne.s32.totalorder %s31_s27, %s601_s8  ;;  %p607_p13 = scmp.lt.s32.totalorder %s601_s8, %s601_s8 }
  0x1e   :  { %p608_p0 = por %p607_p13, %p606_p12 }
  0x20   :  { %p609_p1 = pnand %p608_p0, %p602_p11 }
  0x22   :  { %612 = shalt.err (!%p609_p1)
}
  0x23   :  { %36 = dma.hbm_to_vmem [thread:$0]  %s760_s1, 1024, %s31_s27, [#allocation7], %s666_s22, %s666_s22, %s667_s23  }
  0x24   :  { %657 = dma.done.wait [#allocation4], 1024  }
  0x25   :  { %658 = vsyncadd [#allocation4], 4294966272 }
  0x26   :  { %659 = dma.done.wait [#allocation7], 1024  }
  0x27   :  { %660 = vsyncadd [#allocation7], 4294966272  ;;  %v553_v0 = vld [vmem:[#allocation6] sm:$0xff]   ;;  %v554_v1 = vld [vmem:[#allocation6 + $0x8] sm:$0xff]   ;;  %s669_s1 = smov [#allocation8]  }
  0x28   :  { %497 = vmatprep.subr.bf16.mxu0 %v553_v0  ;;  %529 = vmatprep.subr.bf16.mxu1 %v553_v0  ;;  %v555_v2 = vld [vmem:[#allocation6 + $0x10] sm:$0xff]   ;;  %v556_v3 = vld [vmem:[#allocation6 + $0x18] sm:$0xff]   ;;  %v561_v4 = vld [vmem:[#allocation3] sm:$0xff]   ;;  %s438_s10 = sshll.u32 %s669_s1, 4  ;;  %s439_s10 = int_to_ptr.vmem [resolvable:$true] %s438_s10 }
  0x29   :  { %498 = vmatpush3.bf16.msra.mxu0 %v553_v0  ;;  %537 = vmatpush3.bf16.msra.mxu1 %v553_v0  ;;  %v557_v5 = vld [vmem:[#allocation6 + $0x20] sm:$0xff]   ;;  %v558_v7 = vld [vmem:[#allocation6 + $0x28] sm:$0xff]   ;;  %v559_v8 = vld [vmem:[#allocation6 + $0x30] sm:$0xff]   ;;  %s613_s11 = scalar_lea.vmem %s439_s10, 2048  ;;  %p618_p3 = scmp.lt.s32.totalorder %s439_s10, %s439_s10 }
  0x2a   :  { %499 = vmatprep.subr.bf16.mxu0 %v554_v1  ;;  %530 = vmatprep.subr.bf16.mxu1 %v554_v1  ;;  %v565_v6 = vld [vmem:[#allocation3 + $0x20] sm:$0xff]   ;;  %v560_v9 = vld [vmem:[#allocation6 + $0x38] sm:$0xff]   ;;  %v562_v10 = vld [vmem:[#allocation3 + $0x8] sm:$0xff]   ;;  %p614_p2 = scmp.ne.s32.totalorder %s439_s10, %s613_s11  ;;  %p619_p4 = scmp.lt.s32.totalorder %s613_s11, %s613_s11 }
  0x2b   :  { %513 = vmatprep.mubr.bf16.mxu0 %v561_v4  ;;  %521 = vmatprep.mubr.bf16.mxu1 %v565_v6  ;;  %v566_v11 = vld [vmem:[#allocation3 + $0x28] sm:$0xff]   ;;  %v563_v12 = vld [vmem:[#allocation3 + $0x10] sm:$0xff]   ;;  %v564_v14 = vld [vmem:[#allocation3 + $0x18] sm:$0xff]  }
  0x2c   :  { %v567_v13 = vld [vmem:[#allocation3 + $0x30] sm:$0xff]   ;;  %v568_v15 = vld [vmem:[#allocation3 + $0x38] sm:$0xff]   ;;  %p620_p5 = por %p619_p4, %p618_p3 }
  0x2d   :  { %500 = vmatpush3.bf16.msra.mxu0 %v554_v1  ;;  %538 = vmatpush3.bf16.msra.mxu1 %v554_v1 }
  0x2e   :  { %501 = vmatprep.subr.bf16.mxu0 %v555_v2  ;;  %531 = vmatprep.subr.bf16.mxu1 %v555_v2  ;;  %p621_p6 = pnand %p620_p5, %p614_p2 }
  0x31   :  { %502 = vmatpush3.bf16.msra.mxu0 %v555_v2  ;;  %539 = vmatpush3.bf16.msra.mxu1 %v555_v2 }
  0x32   :  { %503 = vmatprep.subr.bf16.mxu0 %v556_v3  ;;  %532 = vmatprep.subr.bf16.mxu1 %v556_v3 }
  0x35   :  { %504 = vmatpush3.bf16.msra.mxu0 %v556_v3  ;;  %540 = vmatpush3.bf16.msra.mxu1 %v556_v3 }
  0x36   :  { %505 = vmatprep.subr.bf16.mxu0 %v557_v5  ;;  %533 = vmatprep.subr.bf16.mxu1 %v557_v5 }
  0x39   :  { %506 = vmatpush3.bf16.msra.mxu0 %v557_v5  ;;  %541 = vmatpush3.bf16.msra.mxu1 %v557_v5 }
  0x3a   :  { %507 = vmatprep.subr.bf16.mxu0 %v558_v7  ;;  %534 = vmatprep.subr.bf16.mxu1 %v558_v7 }
  0x3d   :  { %508 = vmatpush3.bf16.msra.mxu0 %v558_v7  ;;  %542 = vmatpush3.bf16.msra.mxu1 %v558_v7 }
  0x3e   :  { %509 = vmatprep.subr.bf16.mxu0 %v559_v8  ;;  %535 = vmatprep.subr.bf16.mxu1 %v559_v8 }
  0x41   :  { %510 = vmatpush3.bf16.msra.mxu0 %v559_v8  ;;  %543 = vmatpush3.bf16.msra.mxu1 %v559_v8 }
  0x42   :  { %511 = vmatprep.subr.bf16.mxu0 %v560_v9  ;;  %536 = vmatprep.subr.bf16.mxu1 %v560_v9 }
  0x45   :  { %512 = vmatpush3.bf16.msra.mxu0 %v560_v9  ;;  %544 = vmatpush3.bf16.msra.mxu1 %v560_v9 }
  0x48   :  { %514 = vmatmul.mubr.bf16.vlgmr.msra.gmra.mrb[0].mxu0 %v562_v10  ;;  %522 = vmatmul.mubr.bf16.vlgmr.msra.gmra.mrb[0].mxu1 %v566_v11 }
  0x49   :  { %517 = vmatprep.mubr.bf16.mxu0 %v563_v12  ;;  %525 = vmatprep.mubr.bf16.mxu1 %v567_v13 }
  0x50   :  { %518 = vmatmul.mubr.bf16.gmra.mrb[4].mxu0 %v564_v14  ;;  %526 = vmatmul.mubr.bf16.gmra.mrb[4].mxu1 %v568_v15 }
 0x11b   :  { %v515_v16 = vpop.f32.mrb[0].mxu0  ;;  %v717_v17 = vpop.f32.mrb[0].mxu1 }
 0x11c   :  { %358 = vst [vmem:[#allocation8 + $0x10] sm:$0xff] %v515_v16  ;;  %v242_v18 = vpop.f32.mrb[1].mxu0  ;;  %366 = vst [vmem:[#allocation8 + $0x50] sm:$0xff] %v717_v17  ;;  %v720_v19 = vpop.f32.mrb[1].mxu1  ;;  %v395_v27 = vmul.f32 %v515_v16, %v515_v16 }
 0x11d   :  { %356 = vst [vmem:[#allocation8] sm:$0xff] %v242_v18  ;;  %v516_v20 = vpop.f32.mrb[2].mxu0  ;;  %364 = vst [vmem:[#allocation8 + $0x40] sm:$0xff] %v720_v19  ;;  %v723_v21 = vpop.f32.mrb[2].mxu1  ;;  %v393_v24 = vmul.f32 %v242_v18, %v242_v18 }
 0x11e   :  { %359 = vst [vmem:[#allocation8 + $0x18] sm:$0xff] %v516_v20  ;;  %v245_v22 = vpop.f32.mrb[3].mxu0  ;;  %367 = vst [vmem:[#allocation8 + $0x58] sm:$0xff] %v723_v21  ;;  %v277_v23 = vpop.f32.mrb[3].mxu1  ;;  %v396_v30 = vmul.f32 %v516_v20, %v516_v20 }
 0x11f   :  { %357 = vst [vmem:[#allocation8 + $0x8] sm:$0xff] %v245_v22  ;;  %v372_v25 = vadd.f32 %v245_v22, %v242_v18  ;;  %v394_v26 = vmul.f32 %v245_v22, %v245_v22  ;;  %365 = vst [vmem:[#allocation8 + $0x48] sm:$0xff] %v277_v23 }
 0x121   :  { %v373_v28 = vadd.f32 %v515_v16, %v372_v25  ;;  %v409_v29 = vadd.f32 %v394_v26, %v393_v24 }
 0x123   :  { %v410_v31 = vadd.f32 %v409_v29, %v395_v27  ;;  %v519_v32 = vpop.f32.mrb[4].mxu0  ;;  %v374_v33 = vadd.f32 %v516_v20, %v373_v28  ;;  %v527_v34 = vpop.f32.mrb[4].mxu1 }
 0x124   :  { %362 = vst [vmem:[#allocation8 + $0x30] sm:$0xff] %v519_v32  ;;  %v258_v35 = vpop.f32.mrb[5].mxu0  ;;  %370 = vst [vmem:[#allocation8 + $0x70] sm:$0xff] %v527_v34  ;;  %v290_v36 = vpop.f32.mrb[5].mxu1 }
 0x125   :  { %360 = vst [vmem:[#allocation8 + $0x20] sm:$0xff] %v258_v35  ;;  %v375_v37 = vadd.f32 %v374_v33, %v258_v35  ;;  %v397_v38 = vmul.f32 %v258_v35, %v258_v35  ;;  %v411_v39 = vadd.f32 %v410_v31, %v396_v30  ;;  %v520_v40 = vpop.f32.mrb[6].mxu0  ;;  %368 = vst [vmem:[#allocation8 + $0x60] sm:$0xff] %v290_v36  ;;  %v528_v41 = vpop.f32.mrb[6].mxu1 }
 0x126   :  { %363 = vst [vmem:[#allocation8 + $0x38] sm:$0xff] %v520_v40  ;;  %v261_v42 = vpop.f32.mrb[7].mxu0  ;;  %371 = vst [vmem:[#allocation8 + $0x78] sm:$0xff] %v528_v41  ;;  %v293_v43 = vpop.f32.mrb[7].mxu1 }
 0x127   :  { %v412_v44 = vadd.f32 %v411_v39, %v397_v38  ;;  %361 = vst [vmem:[#allocation8 + $0x28] sm:$0xff] %v261_v42  ;;  %v376_v45 = vadd.f32 %v375_v37, %v261_v42  ;;  %v398_v46 = vmul.f32 %v261_v42, %v261_v42  ;;  %369 = vst [vmem:[#allocation8 + $0x68] sm:$0xff] %v293_v43 }
 0x128   :  { %624 = shalt.err (!%p621_p6)
}
 0x129   :  { %s625_s14 = scalar_lea.hbm %s761_s2, 2048 }
 0x12a   :  { %p626_p7 = scmp.ne.s32.totalorder %s761_s2, %s625_s14  ;;  %p629_p8 = scmp.lt.u32.totalorder %s625_s14, %s761_s2 }
 0x12c   :  { %p631_p9 = pnand %p629_p8, %p626_p7 }
 0x12e   :  { %634 = shalt.err (!%p631_p9)
}
 0x12f   :  { %s670_s19 = smov 128   ;;  %s671_s20 = smov 8   ;;  %v399_v47 = vmul.f32 %v519_v32, %v519_v32  ;;  %v377_v48 = vadd.f32 %v519_v32, %v376_v45  ;;  %v413_v49 = vadd.f32 %v412_v44, %v398_v46  ;;  %v400_v50 = vmul.f32 %v520_v40, %v520_v40 }
 0x130   :  { %444 = dma.vmem_to_hbm [thread:$0]  %s439_s10, 2048, %s761_s2, [#allocation5], %s670_s19, %s670_s19, %s671_s20   ;;  %v401_v53 = vmul.f32 %v720_v19, %v720_v19  ;;  %v402_v58 = vmul.f32 %v277_v23, %v277_v23  ;;  %v403_v59 = vmul.f32 %v717_v17, %v717_v17  ;;  %v404_v62 = vmul.f32 %v723_v21, %v723_v21 }
 0x131   :  { %v414_v51 = vadd.f32 %v413_v49, %v399_v47  ;;  %v378_v52 = vadd.f32 %v520_v40, %v377_v48  ;;  %v405_v1 = vmul.f32 %v290_v36, %v290_v36  ;;  %v406_v6 = vmul.f32 %v293_v43, %v293_v43  ;;  %s672_s2 = smov [#allocation9]  }
 0x132   :  { %v407_v7 = vmul.f32 %v527_v34, %v527_v34  ;;  %v408_v10 = vmul.f32 %v528_v41, %v528_v41  ;;  %s451_s23 = sshll.u32 %s672_s2, 4  ;;  %vm430_vm0 = vcmask 1040384   ;;  %s452_s23 = int_to_ptr.vmem [resolvable:$true] %s451_s23 }
 0x133   :  { %v379_v54 = vadd.f32 %v378_v52, %v720_v19  ;;  %v415_v55 = vadd.f32 %v414_v51, %v400_v50  ;;  %s635_s24 = scalar_lea.vmem %s452_s23, 32  ;;  %p640_p11 = scmp.lt.s32.totalorder %s452_s23, %s452_s23 }
 0x134   :  { %p636_p10 = scmp.ne.s32.totalorder %s452_s23, %s635_s24  ;;  %p641_p12 = scmp.lt.s32.totalorder %s635_s24, %s635_s24 }
 0x135   :  { %v416_v56 = vadd.f32 %v415_v55, %v401_v53  ;;  %v380_v57 = vadd.f32 %v379_v54, %v277_v23 }
 0x136   :  { %p642_p13 = por %p641_p12, %p640_p11 }
 0x137   :  { %v381_v60 = vadd.f32 %v717_v17, %v380_v57  ;;  %v417_v61 = vadd.f32 %v416_v56, %v402_v58 }
 0x138   :  { %p643_p0 = pnand %p642_p13, %p636_p10 }
 0x139   :  { %v418_v63 = vadd.f32 %v417_v61, %v403_v59  ;;  %v382_v0 = vadd.f32 %v723_v21, %v381_v60 }
 0x13b   :  { %v383_v2 = vadd.f32 %v382_v0, %v290_v36  ;;  %v419_v3 = vadd.f32 %v418_v63, %v404_v62 }
 0x13d   :  { %v420_v4 = vadd.f32 %v419_v3, %v405_v1  ;;  %v384_v5 = vadd.f32 %v383_v2, %v293_v43 }
 0x13f   :  { %v385_v8 = vadd.f32 %v527_v34, %v384_v5  ;;  %v421_v9 = vadd.f32 %v420_v4, %v406_v6 }
 0x141   :  { %v386_v11 = vadd.f32 %v528_v41, %v385_v8  ;;  %v422_v12 = vadd.f32 %v421_v9, %v407_v7 }
 0x143   :  { %v387_v13 = vrot.slane %v386_v11, 4  ;;  %v423_v14 = vadd.f32 %v422_v12, %v408_v10 }
 0x145   :  { %v388_v15 = vadd.f32 %v387_v13, %v386_v11  ;;  %v424_v16 = vrot.slane %v423_v14, 4 }
 0x147   :  { %v389_v17 = vrot.slane %v388_v15, 2  ;;  %v425_v18 = vadd.f32 %v424_v16, %v423_v14 }
 0x149   :  { %v390_v19 = vadd.f32 %v389_v17, %v388_v15  ;;  %v426_v20 = vrot.slane %v425_v18, 2 }
 0x14b   :  { %v391_v21 = vrot.slane %v390_v19, 1  ;;  %v427_v22 = vadd.f32 %v426_v20, %v425_v18 }
 0x14d   :  { %v428_v23 = vrot.slane %v427_v22, 1  ;;  %v392_v24 = vadd.f32 %v391_v21, %v390_v19 }
 0x14f   :  { %v429_v25 = vadd.f32 %v428_v23, %v427_v22 }
 0x151   :  { %v431_v26 = vsel %vm430_vm0, %v392_v24, %v429_v25 }
 0x152   :  { %432 = vst [vmem:[#allocation9] sm:$0x3] %v431_v26 }
 0x153   :  { %646 = shalt.err (!%p643_p0)
}
 0x154   :  { %s647_s27 = scalar_lea.hbm %s762_s3, 32 }
 0x155   :  { %p648_p1 = scmp.ne.s32.totalorder %s762_s3, %s647_s27  ;;  %p651_p2 = scmp.lt.u32.totalorder %s647_s27, %s762_s3 }
 0x157   :  { %p653_p3 = pnand %p651_p2, %p648_p1 }
 0x159   :  { %656 = shalt.err (!%p653_p3)
}
 0x15a   :  { %454 = dma.vmem_to_hbm [thread:$0]  %s452_s23, 32, %s762_s3, [#allocation10]  }
 0x15b   :  { %661 = dma.done.wait [#allocation5], 2048  }
 0x15c   :  { %662 = vsyncadd [#allocation5], 4294965248 }
 0x15d   :  { %663 = dma.done.wait [#allocation10], 32  }
 0x15e   :  { %664 = vsyncadd [#allocation10], 4294967264 }
 0x15f   :  { %461 = vsyncpa [#allocation4], 1 }
 0x160   :  { %462 = vsyncpa [#allocation7], 1 }
 0x161   :  { %463 = vsyncpa [#allocation5], 1 }
 0x162   :  { %464 = vsyncpa [#allocation10], 1 }

</bundles_post_ra>
